<compile_context>
chip_gen: v7x
topology: tpu7x:2x2x1
jax: 0.10.0
libtpu: 0.0.40
codegen_flags: <defaults>
</compile_context>

<pallas_src>
import functools

import jax
import jax.numpy as jnp
from jax import lax
from jax.experimental import pallas as pl
from jax.experimental.pallas import tpu as pltpu


def cross_attention_kernel(
    fmap_ref,   # (1, C, HW_t)       channels-first, HW on lanes
    ctx_ref,    # (1, N, Dc)
    keep_ref,   # (1, N, 1)  f32     1.0 keep / 0.0 masked
    sel_ref,    # (heads, DI) f32    block-diagonal head selector
    wq_ref,     # (DI, C)            to_q weight; scale * sqrt(C)*gamma_f folded in
    wkT_ref,    # (Dc, DI)           to_kv k-half, transposed; sqrt(Dc)*gamma_c folded in
    wvT_ref,    # (Dc, DI)           to_kv v-half, transposed; sqrt(Dc)*gamma_c folded in
    wout_ref,   # (C, DI)            to_out weight (natural layout)
    out_ref,    # (1, C, HW_t)
    attn_ref,   # (1, heads*N, HW_t)
    kbd_ref,    # VMEM scratch (heads*N, DI): block-diagonal k      (per batch)
    wv_ref,     # VMEM scratch (C, heads*N):  fused wout @ v_bd^T   (per batch)
    *,
    heads,
    dim_head,
    hoist,
):
    f32 = jnp.float32
    eps2 = jnp.float32(1e-24)               # F.normalize eps (1e-12), squared
    N = ctx_ref.shape[1]
    DI = heads * dim_head
    HN = heads * N

    def ctx_factors():
        # RMSNorm on context (lane reduction over Dc); rsqrt goes to the EUP.
        ctx = ctx_ref[0]                                              # (N, Dc)
        c_ss = jnp.sum(ctx * ctx, axis=-1, keepdims=True)             # (N, 1)
        ctx_n = ctx * lax.rsqrt(jnp.maximum(c_ss, eps2))
        # sqrt(Dc)*gamma_c already folded into wkT / wvT.
        k = jnp.dot(ctx_n, wkT_ref[...], preferred_element_type=f32)  # (N, DI)
        v = jnp.dot(ctx_n, wvT_ref[...], preferred_element_type=f32)  # (N, DI)
        # Block-diagonal expansion: ONE K=DI matmul per tile instead of
        # `heads` near-empty K=dim_head systolic passes.
        sel = sel_ref[...].reshape(heads, 1, DI)                      # (h,1,DI)
        k_bd = (k[None, :, :] * sel).reshape(HN, DI)                  # (h*N, DI)
        v_bd = (v[None, :, :] * sel).reshape(HN, DI)                  # (h*N, DI)
        # Fused output-projection factor: column h*N+j is wout_h @ v_h[j].
        wv = lax.dot_general(wout_ref[...], v_bd,
                             (((1,), (1,)), ((), ())),
                             preferred_element_type=f32)              # (C, h*N)
        return k_bd, wv

    if hoist:
        # Batch-only work: compute once per batch (t == 0), persist in scratch
        # across the (sequential, "arbitrary") HW-tile axis.
        @pl.when(pl.program_id(1) == 0)
        def _():
            k_bd, wv = ctx_factors()
            kbd_ref[...] = k_bd
            wv_ref[...] = wv

        k_bd = kbd_ref[...]
        wv = wv_ref[...]
    else:
        # HW-tile axis is megacore-parallel: keep steps independent, recompute
        # the (tiny) context factors per tile.
        k_bd, wv = ctx_factors()

    # ChannelRMSNorm on the feature map (sublane reduction over C).
    x = fmap_ref[0]                                                   # (C, HW_t)
    f_ss = jnp.sum(x * x, axis=0, keepdims=True)                      # (1, HW_t)
    x_n = x * lax.rsqrt(jnp.maximum(f_ss, eps2))
    # q projection; softmax scale and sqrt(C)*gamma_f folded into wq.
    q_t = jnp.dot(wq_ref[...], x_n, preferred_element_type=f32)       # (DI, HW_t)

    # All heads in one MXU pass (K = DI).
    sim = jnp.dot(k_bd, q_t, preferred_element_type=f32)              # (h*N, HW_t)
    hw_t = sim.shape[-1]

    # masked_fill (exact select semantics) + segmented softmax over the
    # context dim, per head, via a (heads, N, HW_t) view.
    sim3 = sim.reshape(heads, N, hw_t)
    keep = keep_ref[0] != 0.0                                         # (N, 1)
    neg_fill = jnp.float32(-jnp.finfo(jnp.float32).max)
    sim3 = jnp.where(keep[None, :, :], sim3, neg_fill)
    m = jnp.max(sim3, axis=1, keepdims=True)                          # (h,1,HW_t)
    p = jnp.exp(sim3 - m)
    l = jnp.sum(p, axis=1, keepdims=True)                             # (h,1,HW_t)
    attn = (p / l).reshape(HN, hw_t)                                  # exact divide

    # Single lane/sublane-dense attn store (cast here: bf16 option for v5e).
    attn_ref[0] = attn.astype(attn_ref.dtype)

    # Fused to_out: (C, heads*N) @ (heads*N, HW_t).
    out_ref[0] = jnp.dot(wv, attn, preferred_element_type=f32).astype(out_ref.dtype)


def _vmem_limit_bytes():
    """Generation-aware scoped-VMEM limit: half the physical VMEM, <= 64 MiB."""
    cap = 64 * 1024 * 1024      # conservative default: v7x physical per core
    try:
        cap = int(getattr(pltpu.get_tpu_info(), "vmem_capacity_bytes", cap))
    except Exception:
        pass
    return int(min(cap // 2, 64 * 1024 * 1024))


def _pick_hw_tile(hw, *, bytes_per_col, vmem_budget, min_tiles=1):
    """Largest lane-dense (multiple-of-128) HW tile within the VMEM budget.

    Returns the full extent when everything fits (always a legal block).
    Non-divisible HW is handled by the caller with a pl.cdiv grid; the masked
    tail only touches independent lane columns, so the math stays correct.
    """
    cap_cols = max(128, (vmem_budget // max(bytes_per_col, 1)) // 128 * 128)
    want = hw if min_tiles <= 1 else -(-hw // min_tiles)   # ceil(hw / min_tiles)
    blk = min(cap_cols, ((want + 127) // 128) * 128)
    if blk >= hw:
        return hw
    return blk


def cross_attention(fmap_nchw, context, mask_bool, params, *, heads, dim_head,
                    attn_dtype=jnp.float32):
    B, C, H, W = fmap_nchw.shape
    _, N, Dc = context.shape
    HW = H * W
    DI = heads * dim_head
    scale = dim_head ** -0.5

    # ---- fold norm gammas / sqrt(dim) / softmax scale into the weights ------
    # (into the WEIGHTS, not the activations: tiny host-side ops, fused by XLA)
    g_f = (C ** 0.5) * params["gamma_f"].reshape(1, C)            # per q input channel
    wq_eff = params["wq"].astype(jnp.float32) * g_f * scale       # (DI, C)
    g_c = (Dc ** 0.5) * params["gamma_c"].reshape(Dc, 1)          # per kv input feature
    wkvT_eff = params["wkvT"].astype(jnp.float32) * g_c           # (Dc, 2*DI)
    wkT = wkvT_eff[:, :DI]
    wvT = wkvT_eff[:, DI:]
    wout = params["wout"].astype(jnp.float32)                     # (C, DI)

    # Block-diagonal head selector (heads, DI): sel[h, di] = 1 iff di in head h.
    sel = (jnp.arange(DI)[None, :] // dim_head
           == jnp.arange(heads)[:, None]).astype(jnp.float32)

    # NCHW -> (B, C, HW): pure reshape, HW lands on the lane axis (no transpose).
    fmap_t = fmap_nchw.reshape(B, C, HW)
    keep_f = mask_bool.astype(jnp.float32).reshape(B, N, 1)

    # ---- generation-aware HW tiling -----------------------------------------
    vmem_limit = _vmem_limit_bytes()
    attn_bytes = jnp.dtype(attn_dtype).itemsize
    # Dominant per-lane-column VMEM: double-buffered fmap/out/attn blocks plus
    # the live q_t / sim / p / attn temporaries.
    bytes_per_col = (4 * (2 * C + 2 * C + DI + 3 * heads * N)
                     + 2 * heads * N * attn_bytes)
    # Keep both v7x TensorCores busy: if B == 1, split HW into >= 2 parallel
    # tiles (and then don't hoist, so tiles stay independent). With B >= 2 the
    # batch axis already provides the parallel steps -> take the largest tile.
    min_tiles = 1 if B >= 2 else 2
    block_hw = _pick_hw_tile(HW, bytes_per_col=bytes_per_col,
                             vmem_budget=int(vmem_limit * 0.75),
                             min_tiles=min_tiles)
    n_hw_tiles = pl.cdiv(HW, block_hw)
    hoist = (B >= 2) or (n_hw_tiles == 1)
    t_sem = "arbitrary" if (hoist and n_hw_tiles > 1) else "parallel"

    kernel = functools.partial(cross_attention_kernel, heads=heads,
                               dim_head=dim_head, hoist=hoist)

    out_t, attn = pl.pallas_call(
        kernel,
        out_shape=(
            jax.ShapeDtypeStruct((B, C, HW), jnp.float32),
            jax.ShapeDtypeStruct((B, heads * N, HW), attn_dtype),
        ),
        grid=(B, n_hw_tiles),
        in_specs=[
            pl.BlockSpec((1, C, block_hw), lambda b, t: (b, 0, t)),
            pl.BlockSpec((1, N, Dc), lambda b, t: (b, 0, 0)),
            pl.BlockSpec((1, N, 1), lambda b, t: (b, 0, 0)),
            pl.BlockSpec((heads, DI), lambda b, t: (0, 0)),
            pl.BlockSpec((DI, C), lambda b, t: (0, 0)),
            pl.BlockSpec((Dc, DI), lambda b, t: (0, 0)),
            pl.BlockSpec((Dc, DI), lambda b, t: (0, 0)),
            pl.BlockSpec((C, DI), lambda b, t: (0, 0)),
        ],
        out_specs=(
            pl.BlockSpec((1, C, block_hw), lambda b, t: (b, 0, t)),
            pl.BlockSpec((1, heads * N, block_hw), lambda b, t: (b, 0, t)),
        ),
        scratch_shapes=[
            pltpu.VMEM((heads * N, DI), jnp.float32),   # block-diagonal k
            pltpu.VMEM((C, heads * N), jnp.float32),    # wout @ v_bd^T
        ],
        compiler_params=pltpu.CompilerParams(
            dimension_semantics=("parallel", t_sem),
            vmem_limit_bytes=vmem_limit,
        ),
    )(fmap_t, context, keep_f, sel, wq_eff, wkT, wvT, wout)

    # Pure reshapes: the kernel already emits the target layouts.
    out_nchw = out_t.reshape(B, C, H, W)
    # attn rearrange '(b h) (x y) j -> b (h j) x y' == reshape of (B, heads*N, HW)
    attn_nchw = attn.reshape(B, heads * N, H, W)
    return out_nchw, attn_nchw


def cross_attention_ref(fmap, context, mask, params, *, heads, dim_head):
    """Pure-JAX reference mirroring the PyTorch module's forward."""
    B, C, H, W = fmap.shape
    _, N, Dc = context.shape
    DI = heads * dim_head
    scale = dim_head ** -0.5
    eps = 1e-12

    fn = jnp.sqrt(jnp.sum(fmap * fmap, axis=1, keepdims=True))
    fmap_n = (fmap / jnp.maximum(fn, eps)
              * (C ** 0.5) * params["gamma_f"].reshape(1, C, 1, 1))
    cn = jnp.sqrt(jnp.sum(context * context, axis=-1, keepdims=True))
    ctx_n = (context / jnp.maximum(cn, eps)
             * (Dc ** 0.5) * params["gamma_c"].reshape(1, 1, Dc))

    q = jnp.einsum("oc,bchw->bohw", params["wq"], fmap_n)            # (B,DI,H,W)
    kv = jnp.einsum("bnd,dm->bnm", ctx_n, params["wkvT"])            # (B,N,2*DI)
    k, v = kv[..., :DI], kv[..., DI:]

    q = q.reshape(B, heads, dim_head, H * W).transpose(0, 1, 3, 2)   # (B,h,HW,d)
    k = k.reshape(B, N, heads, dim_head).transpose(0, 2, 1, 3)       # (B,h,N,d)
    v = v.reshape(B, N, heads, dim_head).transpose(0, 2, 1, 3)       # (B,h,N,d)

    sim = jnp.einsum("bhid,bhjd->bhij", q, k) * scale                # (B,h,HW,N)
    sim = jnp.where(mask[:, None, None, :], sim, -jnp.finfo(sim.dtype).max)
    attn = jax.nn.softmax(sim, axis=-1)
    out = jnp.einsum("bhij,bhjd->bhid", attn, v)                     # (B,h,HW,d)
    out = out.transpose(0, 1, 3, 2).reshape(B, DI, H, W)
    out = jnp.einsum("oc,bchw->bohw", params["wout"], out)           # (B,C,H,W)
    attn_nchw = attn.transpose(0, 1, 3, 2).reshape(B, heads * N, H, W)
    return out, attn_nchw


if __name__ == "__main__":
    B, C, H, W = 2, 4, 16, 16        # fmap: batch=2, dim=4, spatial=16x16
    N, Dc = 8, 32                    # context: seq=8, dim_context=32
    heads, dim_head = 4, 8
    DI = heads * dim_head

    key = jax.random.PRNGKey(0)
    k1, k2, k3, k4, k5 = jax.random.split(key, 5)

    fmap = jax.random.normal(k1, (B, C, H, W), jnp.float32)
    context = jax.random.normal(k2, (B, N, Dc), jnp.float32)
    lengths = jnp.array([N, 5])
    mask = jnp.arange(N)[None, :] < lengths[:, None]     # (B, N) bool

    # Deterministic synthetic parameters (gamma init matches nn.Module defaults).
    #   wq  : to_q.weight  squeezed, natural layout (DI, C)
    #   wkvT: to_kv.weight transposed, (Dc, 2*DI)
    #   wout: to_out.weight squeezed, natural layout (C, DI)
    params = {
        "gamma_f": jnp.ones((C,), jnp.float32),
        "gamma_c": jnp.ones((Dc,), jnp.float32),
        "wq": jax.random.normal(k3, (DI, C), jnp.float32) * 0.05,
        "wkvT": jax.random.normal(k4, (Dc, 2 * DI), jnp.float32) * 0.05,
        "wout": jax.random.normal(k5, (C, DI), jnp.float32) * 0.05,
    }

    out, attn = cross_attention(fmap, context, mask, params,
                                heads=heads, dim_head=dim_head)
    jax.block_until_ready((out, attn))
    assert out.shape == (B, C, H, W)
    assert attn.shape == (B, heads * N, H, W)
    assert bool(jnp.isfinite(out).all()) and bool(jnp.isfinite(attn).all())

    out_ref, attn_ref = cross_attention_ref(fmap, context, mask, params,
                                            heads=heads, dim_head=dim_head)
    assert jnp.allclose(out, out_ref, atol=5e-3, rtol=1e-2), \
        ("out mismatch", float(jnp.max(jnp.abs(out - out_ref))))
    assert jnp.allclose(attn, attn_ref, atol=5e-3, rtol=1e-2), \
        ("attn mismatch", float(jnp.max(jnp.abs(attn - attn_ref))))
    print("KERNEL_OK")
</pallas_src>

<mosaic_0001>
module attributes {stable_mosaic.version = 11 : i64} {
  func.func @cross_attention_kernel(%arg0: i32, %arg1: i32, %arg2: memref<1x4x256xf32, #tpu.memory_space<vmem>>, %arg3: memref<1x8x32xf32, #tpu.memory_space<vmem>>, %arg4: memref<1x8x1xf32, #tpu.memory_space<vmem>>, %arg5: memref<4x32xf32, #tpu.memory_space<vmem>>, %arg6: memref<32x4xf32, #tpu.memory_space<vmem>>, %arg7: memref<32x32xf32, #tpu.memory_space<vmem>>, %arg8: memref<32x32xf32, #tpu.memory_space<vmem>>, %arg9: memref<4x32xf32, #tpu.memory_space<vmem>>, %arg10: memref<1x4x256xf32, #tpu.memory_space<vmem>>, %arg11: memref<1x32x256xf32, #tpu.memory_space<vmem>>, %arg12: memref<32x32xf32, #tpu.memory_space<vmem>>, %arg13: memref<4x32xf32, #tpu.memory_space<vmem>>) attributes {dimension_semantics = [#tpu.dimension_semantics<parallel>, #tpu.dimension_semantics<parallel>], iteration_bounds = array<i64: 2, 1>, scalar_prefetch = 0 : i64, scratch_operands = 2 : i64, tpu.core_type = #tpu.core_type<tc>, window_params = [{transform_indices = @transform_0, window_bounds = array<i64: 1, 4, 256>}, {transform_indices = @transform_1, window_bounds = array<i64: 1, 8, 32>}, {transform_indices = @transform_2, window_bounds = array<i64: 1, 8, 1>}, {pipeline_mode = #tpu.pipeline_mode<synchronous>, transform_indices = @transform_3, window_bounds = array<i64: 4, 32>}, {pipeline_mode = #tpu.pipeline_mode<synchronous>, transform_indices = @transform_4, window_bounds = array<i64: 32, 4>}, {pipeline_mode = #tpu.pipeline_mode<synchronous>, transform_indices = @transform_5, window_bounds = array<i64: 32, 32>}, {pipeline_mode = #tpu.pipeline_mode<synchronous>, transform_indices = @transform_6, window_bounds = array<i64: 32, 32>}, {pipeline_mode = #tpu.pipeline_mode<synchronous>, transform_indices = @transform_7, window_bounds = array<i64: 4, 32>}, {transform_indices = @transform_8, window_bounds = array<i64: 1, 4, 256>}, {transform_indices = @transform_9, window_bounds = array<i64: 1, 32, 256>}]} {
    %c0_i32 = arith.constant 0 : i32
    %0 = arith.cmpi eq, %arg1, %c0_i32 : i32
    %1 = arith.extui %0 : i1 to i32
    %cst = arith.constant 1.000000e-24 : f32
    %c0_i32_0 = arith.constant 0 : i32
    %2 = arith.cmpi ne, %1, %c0_i32_0 : i32
    scf.if %2 {
      %c0_27 = arith.constant 0 : index
      %c0_28 = arith.constant 0 : index
      %c0_29 = arith.constant 0 : index
      %45 = vector.load %arg3[%c0_27, %c0_28, %c0_29] : memref<1x8x32xf32, #tpu.memory_space<vmem>>, vector<1x8x32xf32>
      %46 = vector.shape_cast %45 : vector<1x8x32xf32> to vector<8x32xf32>
      %47 = arith.mulf %46, %46 : vector<8x32xf32>
      %cst_30 = arith.constant dense<0.000000e+00> : vector<8xf32>
      %48 = vector.multi_reduction <add>, %47, %cst_30 [1] : vector<8x32xf32> to vector<8xf32>
      %49 = vector.shape_cast %48 : vector<8xf32> to vector<8x1xf32>
      %50 = vector.broadcast %cst : f32 to vector<8x1xf32>
      %51 = arith.maximumf %49, %50 : vector<8x1xf32>
      %52 = math.rsqrt %51 : vector<8x1xf32>
      %53 = vector.broadcast %52 : vector<8x1xf32> to vector<8x32xf32>
      %54 = arith.mulf %46, %53 : vector<8x32xf32>
      %c0_31 = arith.constant 0 : index
      %c0_32 = arith.constant 0 : index
      %55 = vector.load %arg7[%c0_31, %c0_32] : memref<32x32xf32, #tpu.memory_space<vmem>>, vector<32x32xf32>
      %cst_33 = arith.constant dense<0.000000e+00> : vector<8x32xf32>
      %56 = tpu.matmul %54, %55, %cst_33 {dimension_numbers = #tpu.dot_dimension_numbers<[1], [0], [0], [1], [0, 0, 1, 1], [], []>} : vector<8x32xf32>, vector<32x32xf32>, vector<8x32xf32> -> vector<8x32xf32>
      %c0_34 = arith.constant 0 : index
      %c0_35 = arith.constant 0 : index
      %57 = vector.load %arg8[%c0_34, %c0_35] : memref<32x32xf32, #tpu.memory_space<vmem>>, vector<32x32xf32>
      %cst_36 = arith.constant dense<0.000000e+00> : vector<8x32xf32>
      %58 = tpu.matmul %54, %57, %cst_36 {dimension_numbers = #tpu.dot_dimension_numbers<[1], [0], [0], [1], [0, 0, 1, 1], [], []>} : vector<8x32xf32>, vector<32x32xf32>, vector<8x32xf32> -> vector<8x32xf32>
      %c0_37 = arith.constant 0 : index
      %c0_38 = arith.constant 0 : index
      %59 = vector.load %arg5[%c0_37, %c0_38] : memref<4x32xf32, #tpu.memory_space<vmem>>, vector<4x32xf32>
      %60 = vector.shape_cast %59 : vector<4x32xf32> to vector<4x1x32xf32>
      %61 = vector.shape_cast %56 : vector<8x32xf32> to vector<1x8x32xf32>
      %62 = vector.broadcast %61 : vector<1x8x32xf32> to vector<4x8x32xf32>
      %63 = vector.broadcast %60 : vector<4x1x32xf32> to vector<4x8x32xf32>
      %64 = arith.mulf %62, %63 : vector<4x8x32xf32>
      %65 = vector.shape_cast %64 : vector<4x8x32xf32> to vector<32x32xf32>
      %66 = vector.shape_cast %58 : vector<8x32xf32> to vector<1x8x32xf32>
      %67 = vector.broadcast %66 : vector<1x8x32xf32> to vector<4x8x32xf32>
      %68 = vector.broadcast %60 : vector<4x1x32xf32> to vector<4x8x32xf32>
      %69 = arith.mulf %67, %68 : vector<4x8x32xf32>
      %70 = vector.shape_cast %69 : vector<4x8x32xf32> to vector<32x32xf32>
      %c0_39 = arith.constant 0 : index
      %c0_40 = arith.constant 0 : index
      %71 = vector.load %arg9[%c0_39, %c0_40] : memref<4x32xf32, #tpu.memory_space<vmem>>, vector<4x32xf32>
      %cst_41 = arith.constant dense<0.000000e+00> : vector<4x32xf32>
      %72 = tpu.matmul %71, %70, %cst_41 {dimension_numbers = #tpu.dot_dimension_numbers<[1], [1], [0], [0], [0, 0, 1, 0], [], []>} : vector<4x32xf32>, vector<32x32xf32>, vector<4x32xf32> -> vector<4x32xf32>
      %c0_42 = arith.constant 0 : index
      %c0_43 = arith.constant 0 : index
      %73 = vector.load %arg12[%c0_42, %c0_43] : memref<32x32xf32, #tpu.memory_space<vmem>>, vector<32x32xf32>
      tpu.vector_store %arg12[%c0_42, %c0_43], %65 {strides = array<i32>} : memref<32x32xf32, #tpu.memory_space<vmem>>, vector<32x32xf32>,
      %c0_44 = arith.constant 0 : index
      %c0_45 = arith.constant 0 : index
      %74 = vector.load %arg13[%c0_44, %c0_45] : memref<4x32xf32, #tpu.memory_space<vmem>>, vector<4x32xf32>
      tpu.vector_store %arg13[%c0_44, %c0_45], %72 {strides = array<i32>} : memref<4x32xf32, #tpu.memory_space<vmem>>, vector<4x32xf32>,
    } else {
    }
    %c0 = arith.constant 0 : index
    %c0_1 = arith.constant 0 : index
    %3 = vector.load %arg12[%c0, %c0_1] : memref<32x32xf32, #tpu.memory_space<vmem>>, vector<32x32xf32>
    %c0_2 = arith.constant 0 : index
    %c0_3 = arith.constant 0 : index
    %4 = vector.load %arg13[%c0_2, %c0_3] : memref<4x32xf32, #tpu.memory_space<vmem>>, vector<4x32xf32>
    %c0_4 = arith.constant 0 : index
    %c0_5 = arith.constant 0 : index
    %c0_6 = arith.constant 0 : index
    %5 = vector.load %arg2[%c0_4, %c0_5, %c0_6] : memref<1x4x256xf32, #tpu.memory_space<vmem>>, vector<1x4x256xf32>
    %6 = vector.shape_cast %5 : vector<1x4x256xf32> to vector<4x256xf32>
    %7 = arith.mulf %6, %6 : vector<4x256xf32>
    %cst_7 = arith.constant dense<0.000000e+00> : vector<256xf32>
    %8 = vector.multi_reduction <add>, %7, %cst_7 [0] : vector<4x256xf32> to vector<256xf32>
    %9 = vector.shape_cast %8 : vector<256xf32> to vector<1x256xf32>
    %cst_8 = arith.constant 1.000000e-24 : f32
    %10 = vector.broadcast %cst_8 : f32 to vector<1x256xf32>
    %11 = arith.maximumf %9, %10 : vector<1x256xf32>
    %12 = math.rsqrt %11 : vector<1x256xf32>
    %13 = vector.broadcast %12 : vector<1x256xf32> to vector<4x256xf32>
    %14 = arith.mulf %6, %13 : vector<4x256xf32>
    %c0_9 = arith.constant 0 : index
    %c0_10 = arith.constant 0 : index
    %15 = vector.load %arg6[%c0_9, %c0_10] : memref<32x4xf32, #tpu.memory_space<vmem>>, vector<32x4xf32>
    %cst_11 = arith.constant dense<0.000000e+00> : vector<32x256xf32>
    %16 = tpu.matmul %15, %14, %cst_11 {dimension_numbers = #tpu.dot_dimension_numbers<[1], [0], [0], [1], [0, 0, 1, 1], [], []>} : vector<32x4xf32>, vector<4x256xf32>, vector<32x256xf32> -> vector<32x256xf32>
    %cst_12 = arith.constant dense<0.000000e+00> : vector<32x256xf32>
    %17 = tpu.matmul %3, %16, %cst_12 {dimension_numbers = #tpu.dot_dimension_numbers<[1], [0], [0], [1], [0, 0, 1, 1], [], []>} : vector<32x32xf32>, vector<32x256xf32>, vector<32x256xf32> -> vector<32x256xf32>
    %18 = vector.shape_cast %17 : vector<32x256xf32> to vector<4x8x256xf32>
    %c0_13 = arith.constant 0 : index
    %c0_14 = arith.constant 0 : index
    %c0_15 = arith.constant 0 : index
    %19 = vector.load %arg4[%c0_13, %c0_14, %c0_15] : memref<1x8x1xf32, #tpu.memory_space<vmem>>, vector<1x8x1xf32>
    %20 = vector.shape_cast %19 : vector<1x8x1xf32> to vector<8x1xf32>
    %cst_16 = arith.constant 0.000000e+00 : f32
    %21 = vector.broadcast %cst_16 : f32 to vector<8x1xf32>
    %22 = arith.cmpf one, %20, %21 : vector<8x1xf32>
    %23 = vector.shape_cast %22 : vector<8x1xi1> to vector<1x8x1xi1>
    %cst_17 = arith.constant -3.40282347E+38 : f32
    %24 = vector.shape_cast %23 : vector<1x8x1xi1> to vector<1x8x1xi1>
    %25 = vector.broadcast %24 : vector<1x8x1xi1> to vector<4x8x256xi1>
    %26 = vector.broadcast %cst_17 : f32 to vector<4x8x256xf32>
    %27 = arith.select %25, %18, %26 : vector<4x8x256xi1>, vector<4x8x256xf32>
    %cst_18 = arith.constant dense<0xFF800000> : vector<4x256xf32>
    %28 = vector.multi_reduction <maximumf>, %27, %cst_18 [1] : vector<4x8x256xf32> to vector<4x256xf32>
    %29 = vector.shape_cast %28 : vector<4x256xf32> to vector<4x1x256xf32>
    %30 = vector.broadcast %29 : vector<4x1x256xf32> to vector<4x8x256xf32>
    %31 = arith.subf %27, %30 : vector<4x8x256xf32>
    %32 = math.exp %31 : vector<4x8x256xf32>
    %cst_19 = arith.constant dense<0.000000e+00> : vector<4x256xf32>
    %33 = vector.multi_reduction <add>, %32, %cst_19 [1] : vector<4x8x256xf32> to vector<4x256xf32>
    %34 = vector.shape_cast %33 : vector<4x256xf32> to vector<4x1x256xf32>
    %35 = vector.broadcast %34 : vector<4x1x256xf32> to vector<4x8x256xf32>
    %36 = arith.divf %32, %35 : vector<4x8x256xf32>
    %37 = vector.shape_cast %36 : vector<4x8x256xf32> to vector<32x256xf32>
    %c0_20 = arith.constant 0 : index
    %c0_21 = arith.constant 0 : index
    %c0_22 = arith.constant 0 : index
    %38 = vector.load %arg11[%c0_20, %c0_21, %c0_22] : memref<1x32x256xf32, #tpu.memory_space<vmem>>, vector<1x32x256xf32>
    %39 = vector.shape_cast %38 : vector<1x32x256xf32> to vector<32x256xf32>
    %40 = vector.shape_cast %37 : vector<32x256xf32> to vector<1x32x256xf32>
    tpu.vector_store %arg11[%c0_20, %c0_21, %c0_22], %40 {strides = array<i32>} : memref<1x32x256xf32, #tpu.memory_space<vmem>>, vector<1x32x256xf32>,
    %cst_23 = arith.constant dense<0.000000e+00> : vector<4x256xf32>
    %41 = tpu.matmul %4, %37, %cst_23 {dimension_numbers = #tpu.dot_dimension_numbers<[1], [0], [0], [1], [0, 0, 1, 1], [], []>} : vector<4x32xf32>, vector<32x256xf32>, vector<4x256xf32> -> vector<4x256xf32>
    %c0_24 = arith.constant 0 : index
    %c0_25 = arith.constant 0 : index
    %c0_26 = arith.constant 0 : index
    %42 = vector.load %arg10[%c0_24, %c0_25, %c0_26] : memref<1x4x256xf32, #tpu.memory_space<vmem>>, vector<1x4x256xf32>
    %43 = vector.shape_cast %42 : vector<1x4x256xf32> to vector<4x256xf32>
    %44 = vector.shape_cast %41 : vector<4x256xf32> to vector<1x4x256xf32>
    tpu.vector_store %arg10[%c0_24, %c0_25, %c0_26], %44 {strides = array<i32>} : memref<1x4x256xf32, #tpu.memory_space<vmem>>, vector<1x4x256xf32>,
    return
  }
  func.func @transform_0(%arg0: i32, %arg1: i32) -> (i32, i32, i32) {
    %c0_i32 = arith.constant 0 : i32
    %c0_i32_0 = arith.constant 0 : i32
    return %arg0, %c0_i32, %arg1 : i32, i32, i32
  }
  func.func @transform_1(%arg0: i32, %arg1: i32) -> (i32, i32, i32) {
    %c0_i32 = arith.constant 0 : i32
    %c0_i32_0 = arith.constant 0 : i32
    %c0_i32_1 = arith.constant 0 : i32
    return %arg0, %c0_i32, %c0_i32_0 : i32, i32, i32
  }
  func.func @transform_2(%arg0: i32, %arg1: i32) -> (i32, i32, i32) {
    %c0_i32 = arith.constant 0 : i32
    %c0_i32_0 = arith.constant 0 : i32
    %c0_i32_1 = arith.constant 0 : i32
    return %arg0, %c0_i32, %c0_i32_0 : i32, i32, i32
  }
  func.func @transform_3(%arg0: i32, %arg1: i32) -> (i32, i32) {
    %c0_i32 = arith.constant 0 : i32
    %c0_i32_0 = arith.constant 0 : i32
    %c0_i32_1 = arith.constant 0 : i32
    return %c0_i32, %c0_i32_0 : i32, i32
  }
  func.func @transform_4(%arg0: i32, %arg1: i32) -> (i32, i32) {
    %c0_i32 = arith.constant 0 : i32
    %c0_i32_0 = arith.constant 0 : i32
    %c0_i32_1 = arith.constant 0 : i32
    return %c0_i32, %c0_i32_0 : i32, i32
  }
  func.func @transform_5(%arg0: i32, %arg1: i32) -> (i32, i32) {
    %c0_i32 = arith.constant 0 : i32
    %c0_i32_0 = arith.constant 0 : i32
    %c0_i32_1 = arith.constant 0 : i32
    return %c0_i32, %c0_i32_0 : i32, i32
  }
  func.func @transform_6(%arg0: i32, %arg1: i32) -> (i32, i32) {
    %c0_i32 = arith.constant 0 : i32
    %c0_i32_0 = arith.constant 0 : i32
    %c0_i32_1 = arith.constant 0 : i32
    return %c0_i32, %c0_i32_0 : i32, i32
  }
  func.func @transform_7(%arg0: i32, %arg1: i32) -> (i32, i32) {
    %c0_i32 = arith.constant 0 : i32
    %c0_i32_0 = arith.constant 0 : i32
    %c0_i32_1 = arith.constant 0 : i32
    return %c0_i32, %c0_i32_0 : i32, i32
  }
  func.func @transform_8(%arg0: i32, %arg1: i32) -> (i32, i32, i32) {
    %c0_i32 = arith.constant 0 : i32
    %c0_i32_0 = arith.constant 0 : i32
    return %arg0, %c0_i32, %arg1 : i32, i32, i32
  }
  func.func @transform_9(%arg0: i32, %arg1: i32) -> (i32, i32, i32) {
    %c0_i32 = arith.constant 0 : i32
    %c0_i32_0 = arith.constant 0 : i32
    return %arg0, %c0_i32, %arg1 : i32, i32, i32
  }
}

</mosaic_0001>

<bundles_post_ra>
// kernel: tpu_custom_call.1
= control target key start
LH: loop header
LB: loop body
LE: loop exit
PB: predicated region body
PF: predicated region fallthrough
CT: control target
= control target key end

     0   :  { %s2411_s0 = inlined_call_operand.hbm [shape: f32[2,4,256], index: 0, kind: input, shape index: {}]   ;;  %s2412_s1 = inlined_call_operand.hbm [shape: f32[2,8,32], index: 1, kind: input, shape index: {}]   ;;  %s2413_s2 = inlined_call_operand.vmem [shape: f32[2,8,1], index: 2, kind: input, shape index: {}]   ;;  %s2414_s3 = inlined_call_operand.hbm [shape: f32[4,32], index: 3, kind: input, shape index: {}]   ;;  %s2415_s4 = inlined_call_operand.vmem [shape: f32[32,4], index: 4, kind: input, shape index: {}]   ;;  %s2416_s5 = inlined_call_operand.vmem [shape: f32[32,32], index: 5, kind: input, shape index: {}]   ;;  %s2417_s6 = inlined_call_operand.vmem [shape: f32[32,32], index: 6, kind: input, shape index: {}]   ;;  %s2418_s7 = inlined_call_operand.vmem [shape: f32[4,32], index: 7, kind: input, shape index: {}]   ;;  %s2419_s8 = inlined_call_operand.hbm [shape: f32[2,4,256], index: 8, kind: output, shape index: {0}]   ;;  %s2420_s9 = inlined_call_operand.hbm [shape: f32[2,32,256], index: 9, kind: output, shape index: {1}]  }
   0x1   :  { %2431 = sst [smem:[#allocation24_spill]] %s2414_s3 }
   0x2   :  { %2432 = sst [smem:[#allocation25_spill]] %s2419_s8 }
   0x3   :  { %15 = vsyncpa [#allocation5], 0 }
   0x4   :  { %17 = vsyncpa [#allocation5 + $0x1], 0 }
   0x5   :  { %18 = vsyncpa [#allocation8], 0 }
   0x6   :  { %20 = vsyncpa [#allocation8 + $0x1], 0 }
   0x7   :  { %21 = vsyncpa [#allocation6], 0 }
   0x8   :  { %23 = vsyncpa [#allocation6 + $0x1], 0 }
   0x9   :  { %24 = vsyncpa [#allocation12], 0 }
   0xa   :  { %26 = vsyncpa [#allocation12 + $0x1], 0  ;;  %s1984_s30 = smov 0   ;;  %s1986_s10 = smov 0  }
   0xb   :  { %s1988_s11 = smov 0   ;;  %s1990_s12 = smov 0  }
   0xc   :  { %s1992_s13 = smov 0   ;;  %s1994_s14 = smov 0  }
   0xd LB: > { %2433 = sst [smem:[#allocation18_spill]] %s1900_s30  ;;  %s2015_s15 = sadd.s32 4294967295, %s1920_s14   ;;  %s1920_s14 = sphi %s1994_s14, %s32_s14   ;;  %s1916_s13 = sphi %s1992_s13, %s2464_s13   ;;  %s1912_s12 = sphi %s1990_s12, %s2463_s12   ;;  %s1908_s11 = sphi %s1988_s11, %s2462_s11   ;;  %s1904_s10 = sphi %s1986_s10, %s2466_s10   ;;  %s1900_s30 = sphi %s1984_s30, %s2465_s30  }
   0xe   : > { %2434 = sst [smem:[#allocation19_spill]] %s1908_s11  ;;  %s1449_s16 = sadd.s32 4294967294, %s1920_s14  }
   0xf   : > { %2435 = sst [smem:[#allocation20_spill]] %s1916_s13  ;;  %p66_p0 = scmp.ne.s32.totalorder %s1904_s10, %s1900_s30 }
  0x10   : > { %p2422_p1 = scmp.eq.s32.totalorder %s2015_s15, 0  ;;  %p255_p3 = scmp.eq.s32.totalorder %s1449_s16, 1 }
  0x11   : > { %p1450_p5 = scmp.ge.s32.totalorder %s1920_s14, 1  ;;  %p290_p7 = scmp.lt.s32.totalorder %s1920_s14, 3 }
  0x12   : > { %p2024_p4 = por %p2422_p1, %p66_p0  ;;  %p2029_p6 = por %p255_p3, %p66_p0 }
  0x13   : > { %p2034_p8 = pnand %p1450_p5, %p290_p7  ;;  %s1922_s20 = smov [#allocation9]  }
  0x14   : > { %s2436_s17 = scalar_select %p2024_p4, 1, 0 }
  0x15   : > { %s2437_s18 = scalar_select %p2029_p6, 1, 0 }
  0x16   : > { %s2439_s19 = scalar_select %p2034_p8, 1, 0 }
  0x17   : > { %2438 = sst [smem:[#allocation21_spill]] %s2437_s18  ;;  %s303_s21 = sshll.u32 %s1922_s20, 4  ;;  %s304_s21 = int_to_ptr.vmem [resolvable:$true] %s303_s21 }
  0x18   : > { %p1593_p10 = pneg %p2034_p8  ;;  %s44_s23 = sadd.s32 1, %s1916_s13 }
  0x19   : > { %p2049_p12 = scmp.ge.s32.totalorder %s44_s23, 2  ;;  %s2442_s3 = sld [smem:[#allocation24_spill]] }
  0x1a   : > { %p2043_p11 = pnand %p1593_p10, %p2422_p1 }
  0x1b   : > { %s2441_s25 = scalar_select %p2049_p12, 1, 0 }
  0x1c   : > { %p1712_p0 = pneg %p2043_p11 }
  0x1f   : > { %s1710_s28 = scalar_lea.hbm %s2442_s3, 64 }
  0x20   : > { %p1711_p13 = scmp.ne.s32.totalorder %s2442_s3, %s1710_s28  ;;  %p1717_p7 = scmp.lt.u32.totalorder %s1710_s28, %s2442_s3 }
  0x22   : > { %p1713_p3 = pnand %p1712_p0, %p1711_p13 }
  0x24   : > { %p1714_p5 = pneg %p1713_p3 }
  0x26   : > { %p1719_p10 = pnand %p1717_p7, %p1714_p5 }
  0x28   : > { %1722 = shalt.err (!%p1719_p10)
}
  0x29   : > { %s1723_s24 = scalar_lea.vmem %s304_s21, 64  ;;  %p1731_p6 = scmp.lt.s32.totalorder %s304_s21, %s304_s21 }
  0x2a   : > { %p1724_p9 = scmp.ne.s32.totalorder %s304_s21, %s1723_s24  ;;  %p1732_p4 = scmp.lt.s32.totalorder %s1723_s24, %s1723_s24 }
  0x2c   : > { %p1726_p1 = pnand %p1724_p9, %p1712_p0  ;;  %p1733_p8 = por %p1732_p4, %p1731_p6 }
  0x2e   : > { %p1727_p2 = pneg %p1726_p1 }
  0x30   : > { %p1734_p12 = pnand %p1733_p8, %p1727_p2 }
  0x32   : > { %1737 = shalt.err (!%p1734_p12)
}
  0x33   : > { %1596 = dma.hbm_to_vmem [thread:$0]  (!%p2043_p11), %s2442_s3, 64, %s304_s21, [#allocation8]  }
  0x34   : > { %p2443_p1 = scmp.ne.s32.totalorder %s2441_s25, 0  ;;  %p60_p2 = scmp.ne.s32.totalorder %s1908_s11, %s1904_s10 }
  0x35   : > { %p61_p4 = scmp.eq.s32.totalorder %s1920_s14, 0  ;;  %p1612_p6 = scmp.lt.s32.totalorder %s1920_s14, 2 }
  0x36   : > { %s2468_s23 = smov (%p2443_p1, %s44_s23), 0  ;;  %p2445_p12 = scmp.eq.s32.totalorder %s2015_s15, 1 }
  0x37   : > { %2444 = sst [smem:[#allocation22_spill]] %s2468_s23  ;;  %s48_s18 = ssub.s32 %s1916_s13, %s2468_s23 }
  0x38   : > { %p51_p8 = scmp.eq.s32.totalorder %s48_s18, 0  ;;  %p62_p9 = por %p61_p4, %p60_p2 }
  0x39   : > { %p2081_p13 = por %p2445_p12, %p60_p2  ;;  %s326_s24 = sand.u32 1, %s1908_s11  }
  0x3a   : > { %s2447_s28 = sadd.s32 1, %s1908_s11  ;;  %s2091_s21 = sshll.u32 %s326_s24, 3 }
  0x3b   : > { %s2446_s22 = scalar_select %p2081_p13, 1, 0 }
  0x3c   : > { %s2089_s29 = scalar_select %p51_p8, %s1908_s11, %s2447_s28  }
  0x3d   : > { %s1492_s25 = sshll.u32 %s1916_s13, 7  ;;  %s330_s27 = scalar_lea.vmem [#allocation4], %s2091_s21 }
  0x3e   : > { %2448 = sst [smem:[#allocation23_spill]] %s2089_s29  ;;  %s2097_s26 = scalar_lea.hbm %s2411_s0, %s1492_s25 }
  0x3f   : > { %s340_s18 = sshll.u32 %s330_s27, 4  ;;  %p2102_p11 = pnand %p1612_p6, %p62_p9  ;;  %s2100_s18 = int_to_ptr.vmem [resolvable:$true] %s340_s18 }
  0x40   : > { %s2109_s16 = scalar_lea.hbm %s2412_s1, %s1492_s25  ;;  %s347_s20 = sand.u32 1, %s1920_s14  }
  0x41   : > { %s327_s13 = scalar_lea.sflag [#allocation5], %s326_s24  ;;  %s1738_s29 = scalar_lea.hbm %s2097_s26, 128 }
  0x42   : > { %p1739_p0 = scmp.ne.s32.totalorder %s2097_s26, %s1738_s29  ;;  %p1740_p3 = pneg %p2102_p11 }
  0x43   : > { %s1743_s30 = scalar_lea.hbm %s2411_s0, 256  ;;  %p1744_p10 = scmp.lt.u32.totalorder %s2097_s26, %s2411_s0 }
  0x44   : > { %p1741_p5 = pnand %p1740_p3, %p1739_p0  ;;  %p1745_p1 = scmp.lt.u32.totalorder %s1743_s30, %s1738_s29 }
  0x45   : > { %p1747_p4 = scmp.lt.u32.totalorder %s1738_s29, %s2097_s26 }
  0x46   : > { %p1742_p7 = pneg %p1741_p5  ;;  %p1746_p2 = por %p1745_p1, %p1744_p10 }
  0x48   : > { %p1748_p6 = por %p1747_p4, %p1746_p2 }
  0x4a   : > { %p1749_p8 = pnand %p1748_p6, %p1742_p7 }
  0x4c   : > { %1752 = shalt.err (!%p1749_p8)
}
  0x4d   : > { %s1753_s23 = scalar_lea.vmem %s2100_s18, 128  ;;  %s1923_s11 = smov [#allocation4]  }
  0x4e   : > { %p1754_p9 = scmp.ne.s32.totalorder %s2100_s18, %s1753_s23  ;;  %s1758_s24 = sshll.u32 %s1923_s11, 4  ;;  %s1759_s24 = int_to_ptr.vmem [resolvable:$false] %s1758_s24 }
  0x4f   : > { %s1760_s8 = scalar_lea.vmem %s1759_s24, 256  ;;  %p1761_p5 = scmp.lt.s32.totalorder %s2100_s18, %s1759_s24 }
  0x50   : > { %p1756_p12 = pnand %p1754_p9, %p1740_p3  ;;  %p1762_p10 = scmp.lt.s32.totalorder %s1760_s8, %s1753_s23 }
  0x52   : > { %p1757_p0 = pneg %p1756_p12  ;;  %p1763_p1 = por %p1762_p10, %p1761_p5 }
  0x54   : > { %p1764_p2 = pnand %p1763_p1, %p1757_p0 }
  0x56   : > { %1767 = shalt.err (!%p1764_p2)
}
  0x57   : > { %1600 = dma.hbm_to_vmem [thread:$0]  (!%p2102_p11), %s2097_s26, 128, %s2100_s18, %s327_s13  }
  0x58   : > { %s351_s30 = scalar_lea.vmem [#allocation7], %s2091_s21  ;;  %s348_s25 = scalar_lea.sflag [#allocation8], %s347_s20 }
  0x59   : > { %s358_s29 = sshll.u32 %s351_s30, 4  ;;  %s1768_s27 = scalar_lea.hbm %s2109_s16, 128  ;;  %s359_s29 = int_to_ptr.vmem [resolvable:$true] %s358_s29 }
  0x5a   : > { %p1769_p7 = scmp.ne.s32.totalorder %s2109_s16, %s1768_s27  ;;  %s1773_s11 = scalar_lea.hbm %s2412_s1, 256 }
  0x5b   : > { %p1774_p8 = scmp.lt.u32.totalorder %s2109_s16, %s2412_s1  ;;  %p1775_p9 = scmp.lt.u32.totalorder %s1773_s11, %s1768_s27 }
  0x5c   : > { %p1771_p4 = pnand %p1769_p7, %p1740_p3  ;;  %p1777_p0 = scmp.lt.u32.totalorder %s1768_s27, %s2109_s16 }
  0x5d   : > { %p1776_p12 = por %p1775_p9, %p1774_p8 }
  0x5e   : > { %p1772_p6 = pneg %p1771_p4 }
  0x5f   : > { %p1778_p5 = por %p1777_p0, %p1776_p12 }
  0x61   : > { %p1779_p10 = pnand %p1778_p5, %p1772_p6 }
  0x63   : > { %1782 = shalt.err (!%p1779_p10)
}
  0x64   : > { %s1783_s13 = scalar_lea.vmem %s359_s29, 128  ;;  %s1924_s21 = smov [#allocation7]  }
  0x65   : > { %p1784_p1 = scmp.ne.s32.totalorder %s359_s29, %s1783_s13  ;;  %s1788_s26 = sshll.u32 %s1924_s21, 4  ;;  %s1789_s26 = int_to_ptr.vmem [resolvable:$false] %s1788_s26 }
  0x66   : > { %s1790_s18 = scalar_lea.vmem %s1789_s26, 256  ;;  %p1791_p4 = scmp.lt.s32.totalorder %s359_s29, %s1789_s26 }
  0x67   : > { %p1786_p2 = pnand %p1784_p1, %p1740_p3  ;;  %p1792_p13 = scmp.lt.s32.totalorder %s1790_s18, %s1783_s13 }
  0x69   : > { %p1787_p7 = pneg %p1786_p2  ;;  %p1793_p8 = por %p1792_p13, %p1791_p4 }
  0x6b   : > { %p1794_p9 = pnand %p1793_p8, %p1787_p7 }
  0x6d   : > { %1797 = shalt.err (!%p1794_p9)
}
  0x6e   : > { %1603 = dma.hbm_to_vmem [thread:$0]  (!%p2102_p11), %s2109_s16, 128, %s359_s29, %s348_s25  }
  0x6f   : > { %p2450_p6 = scmp.ne.s32.totalorder %s2439_s19, 0 }
  0x70   : > { %s2162_s20 = sand.u32 (!%p2450_p6), 1, %s1904_s10   ;;  %p2451_p13 = scmp.ne.s32.totalorder (!%p2450_p6), %s2436_s17, 0 }
  0x71   : > { %374 = sbr.rel (%p2450_p6) target bundleno = 1266 (0x4f2), region = 52  ;;  %s2165_s30 = sshll.u32 (!%p2450_p6), %s2162_s20, 3 }
  0x72   : > { %s377_s27 = scalar_lea.sflag (!%p2450_p6), [#allocation5], %s2162_s20  ;;  %s380_s3 = scalar_lea.vmem (!%p2450_p6), [#allocation4], %s2165_s30 }
  0x78   : > { %1879 = dma.done.wait (%p2451_p13), %s377_s27, 128  }
  0x79   : > { %1881 = vsyncadd (%p2451_p13), %s377_s27, 4294967168  ;;  %s385_s19 = sand.u32 1, %s2015_s15   ;;  %s389_s16 = scalar_lea.vmem [#allocation7], %s2165_s30 }
  0x7a   : > { %s386_s28 = scalar_lea.sflag [#allocation8], %s385_s19 }
  0x7b   : > { %1883 = dma.done.wait (%p2451_p13), %s386_s28, 128  }
  0x7c   : > { %1885 = vsyncadd (%p2451_p13), %s386_s28, 4294967168  ;;  %p2452_p11 = scmp.eq.s32.totalorder %s2015_s15, 0 }
  0x7e   : > { %1887 = dma.done.wait (%p2452_p11), [#allocation8], 64   ;;  %p2453_p3 = pmov %p2452_p11 }
  0x7f   : > { %v453_v0 = vld [vmem:[%s389_s16] sm:$0xff]  ;;  %vm455_vm0 = vcmask 261120   ;;  %v463_v4 = vld [vmem:[%s2416_s5 + $0x8] sm:$0xff]  ;;  %v1925_v6 = vmov 0.0|0.0   ;;  %vm1926_vm1 = vmmov 0   ;;  %v1927_v14 = vmov 0.0  }
  0x80   : > { %1889 = vsyncadd (%p2453_p3), [#allocation8], 4294967232  ;;  %v454_v1 = vmul.f32 %v453_v0, %v453_v0  ;;  %v462_v3 = vld [vmem:[%s2416_s5] sm:$0xff]  ;;  %1543 = vmatprep.subr.bf16.mxu0 %v1925_v6  ;;  %1549 = vmatprep.subr.bf16.mxu1 %v1925_v6  ;;  %v540_v8 = vld [vmem:[%s2417_s6 + $0x8] sm:$0xff]  ;;  %vm769_vm2 = vcmask 1043456   ;;  %vm799_vm3 = vcmask 31744   ;;  %v626_v49 = vlaneseq }
  0x81   : > { %v539_v5 = vld [vmem:[%s2417_s6] sm:$0xff]  ;;  %v1544_v7 = vpack.c.bf16 %v463_v4, %v462_v3  ;;  %v464_v9 = vld [vmem:[%s2416_s5 + $0x10] sm:$0xff]  ;;  %v465_v10 = vld [vmem:[%s2416_s5 + $0x18] sm:$0xff]  ;;  %1518 = vmatprep.mubr.msk.f32.mxu0 %vm1926_vm1, %v1927_v14  ;;  %1529 = vmatprep.mubr.msk.f32.mxu1 %vm1926_vm1, %v1927_v14  ;;  %v1928_v47 = vmov 1966171168   ;;  %p443_p12 = scmp.lt.s32.totalorder %s1912_s12, 1 }
  0x82   : > { %v456_v2 = vsel %vm455_vm0, %v454_v1, 0.0  ;;  %v1550_v11 = vpack.c.bf16 %v540_v8, %v539_v5  ;;  %v541_v12 = vld [vmem:[%s2417_s6 + $0x10] sm:$0xff]  ;;  %v542_v13 = vld [vmem:[%s2417_s6 + $0x18] sm:$0xff]  ;;  %v1547_v15 = vpack.c.bf16 %v465_v10, %v464_v9  ;;  %v624_v48 = vunpack.c.l.s4 %v1928_v47  ;;  %vm1557_vm4 = vmpackc.low %vm455_vm0, %vm455_vm0  ;;  %s1463_s28 = sshll.u32 %s2162_s20, 6  ;;  %s1251_s17 = scalar_lea.sflag [#allocation12], %s2162_s20 }
  0x83   : > { %457 = vadd.xlane.f32.xlu0 %v456_v2  ;;  %1545 = vmatpush3.bf16.msra.mxu0 %v1544_v7  ;;  %v1553_v16 = vpack.c.bf16 %v542_v13, %v541_v12  ;;  %v764_v21 = vld [vmem:[%s380_s3] sm:$0xff]  ;;  %v796_v46 = vld [vmem:[%s2415_s4 + $0x18] sm:$0xff]  ;;  %v627_v51 = vshrl.u32 %v626_v49, 7  ;;  %s444_s21 = scalar_select %p443_p12, %s1912_s12, 1  ;;  %vm757_vm6 = vcmask 257024  }
  0x84   : > { %1551 = vmatpush3.bf16.msra.mxu1 %v1550_v11  ;;  %1546 = vmatprep.subr.bf16.mxu0 %v1925_v6  ;;  %v765_v22 = vmul.f32 %v764_v21, %v764_v21  ;;  %v795_v45 = vld [vmem:[%s2415_s4 + $0x10] sm:$0xff]  ;;  %v625_v50 = vunpack.c.0.s8 %v624_v48  ;;  %v1467_v52 = vld.sshfl [vmem:[#allocation9] sm:$0x33 pattern:$0x75316420]  ;;  %s2309_s16 = scalar_lea.vmem [#allocation11], %s1463_s28 }
  0x85   : > { %1552 = vmatprep.subr.bf16.mxu1 %v1925_v6  ;;  %v622_v53 = vcombine.high %v1467_v52, %v1467_v52  ;;  %v641_v59 = vsub.s32 0, %v627_v51  ;;  %s1464_s26 = sshll.u32 %s444_s21, 3  ;;  %s1494_s3 = sshll.u32 %s1912_s12, 10 }
  0x86   : > { %v767_v23 = vcombine.high %v765_v22, %v765_v22  ;;  %v770_v24 = vsel %vm769_vm2, %v765_v22, 0.0  ;;  %v628_v54 = vsub.s32 %v625_v50, %v627_v51  ;;  %s446_s19 = scalar_lea.vmem %s2413_s2, %s1464_s26  ;;  %s1282_s29 = sshll.u32 %s2309_s16, 4  ;;  %s2331_s29 = int_to_ptr.vmem [resolvable:$true] %s1282_s29 }
  0x87   : > { %1548 = vmatpush3.bf16.msra.mxu0 %v1547_v15  ;;  %v771_v26 = vrot.slane %v770_v24, 4  ;;  %s2329_s11 = scalar_lea.hbm %s2420_s9, %s1494_s3  ;;  %s1798_s24 = scalar_lea.vmem %s2331_s29, 1024 }
  0x88   : > { %1554 = vmatpush3.bf16.msra.mxu1 %v1553_v16  ;;  %1555 = vmatprep.subr.bf16.mxu0 %v1925_v6  ;;  %v777_v25 = vsel %vm769_vm2, %v767_v23, 0.0  ;;  %v629_v55 = vrot.slane %v1467_v52, %v628_v54  ;;  %v636_v56 = vrot.slane %v622_v53, %v628_v54  ;;  %v667_v16 = vld [vmem:[%s2418_s7] sm:$0xf]  ;;  %p1799_p0 = scmp.ne.s32.totalorder %s2331_s29, %s1798_s24  ;;  %p2454_p5 = scmp.ne.s32.totalorder %s2446_s22, 0 }
  0x89   : > { %v778_v27 = vrot.slane %v777_v25, 4  ;;  %v772_v28 = vadd.f32 %v771_v26, %v770_v24  ;;  %v1929_v24 = vmov 0   ;;  %s1930_s15 = smov [#allocation11]  }
  0x8a   : > { %v637_v57 = vcombine.high %v629_v55, %v629_v55  ;;  %v638_v58 = vcombine.high %v636_v56, %v636_v56  ;;  %v642_v60 = vrot.slane %v629_v55, %v641_v59  ;;  %v646_v61 = vrot.slane %v636_v56, %v641_v59  ;;  %1671 = vset.pattern.permute.xlu0 %v1929_v24  ;;  %p1800_p10 = pnand %p1799_p0, %p2454_p5  ;;  %s1802_s8 = sshll.u32 %s1930_s15, 4  ;;  %s1803_s8 = int_to_ptr.vmem [resolvable:$false] %s1802_s8 }
  0x8b   : > { %v779_v29 = vadd.f32 %v778_v27, %v777_v25  ;;  %v773_v30 = vrot.slane %v772_v28, 2  ;;  %v1007_v25 = vld [vmem:[%s446_s19] sm:$0xff]  ;;  %s1804_s13 = scalar_lea.vmem %s1803_s8, 2048  ;;  %p1805_p2 = scmp.lt.s32.totalorder %s2331_s29, %s1803_s8 }
  0x8c   : > { %v650_v62 = vrot.slane %v637_v57, %v641_v59  ;;  %v654_v63 = vrot.slane %v638_v58, %v641_v59  ;;  %vm1008_vm5 = vcmp.ne.f32.partialorder %v1007_v25, 0.0  ;;  %p1801_p1 = pneg %p1800_p10  ;;  %p1806_p7 = scmp.lt.s32.totalorder %s1804_s13, %s1798_s24 }
  0x8d   : > { %v780_v31 = vrot.slane %v779_v29, 2  ;;  %v774_v32 = vadd.f32 %v773_v30, %v772_v28  ;;  %v1009_v26 = vsel %vm1008_vm5, 1, %v1929_v24 }
  0x8e   : > { %p1807_p4 = por %p1806_p7, %p1805_p2 }
  0x8f   : > { %v781_v33 = vadd.f32 %v780_v31, %v779_v29  ;;  %v775_v34 = vrot.slane %v774_v32, 1 }
  0x90   : > { %p1808_p8 = pnand %p1807_p4, %p1801_p1 }
  0x91   : > { %v782_v35 = vrot.slane %v781_v33, 1  ;;  %v776_v36 = vadd.f32 %v775_v34, %v774_v32 }
  0x93   : > { %v783_v37 = vadd.f32 %v782_v35, %v781_v33  ;;  %v784_v38 = vmax.f32 %v776_v36, 1e-24 }
  0x95   : > { %v785_v39 = vmax.f32 %v783_v37, 1e-24 }
  0x99   : > { %1011 = vperm.xlu0 %1671, %v1009_v26  }
 0x110   : > { %v458_v17 = vpop.xlane.xlu0 %457 }
 0x111   : > { %v459_v18 = vmax.f32 %v458_v17, 1e-24  ;;  %v794_v17 = vld [vmem:[%s2415_s4 + $0x8] sm:$0xff] }
 0x113   : > { %1672 = vrsqrt.f32 %v459_v18 }
 0x114   : > { %1674 = vrsqrt.f32 %v784_v38 }
 0x115   : > { %1676 = vrsqrt.f32 %v785_v39 }
 0x118   : > { %v1012_v39 = vpop.permute.xlu0 %1011 }
 0x119   : > { %vm1013_vm7 = vcmp.eq.s32.totalorder %v1012_v39, 1 }
 0x11d   : > { %v1673_v19 = vpop.eup %1672 }
 0x11e   : > { %v461_v20 = vmul.f32 %v1673_v19, %v453_v0  ;;  %v1675_v40 = vpop.eup %1674 }
 0x11f   : > { %v1677_v41 = vpop.eup %1676 }
 0x120   : > { %1519 = vmatmul.mubr.msk.f32.vlgmr.msra.gmra.mrb[0].mxu0 %vm455_vm0, %v461_v20  ;;  %1530 = vmatmul.mubr.msk.f32.vlgmr.msra.gmra.mrb[0].mxu1 %vm455_vm0, %v461_v20  ;;  %v790_v42 = vcombine.low %v1675_v40, %v1677_v41 }
 0x121   : > { %1540 = vmatprep.mubr.msk.f32.mxu0 %vm1926_vm1, %v1927_v14  ;;  %892 = vmatprep.mubr.f32.mxu1 %v1927_v14 }
 0x122   : > { %v792_v43 = vmul.f32 %v790_v42, %v764_v21 }
 0x124   : > { %v798_v44 = vcombine.high %v792_v43, %v792_v43 }
 0x126   : > { %1579 = vmatprep.subr.msk.mxu1 %vm769_vm2, %v798_v44 }
 0x127   : > { %1580 = vmatpush1.msk.msra.mxu1 %vm769_vm2, %v792_v43 }
 0x128   : > { %1477 = vmatmul.mubr.msk.f32.vlgmr.msra.gmra.mrb[2].mxu1 %vm799_vm3, %v795_v45 }
 0x129   : > { %898 = vmatprep.mubr.f32.mxu1 %v1927_v14 }
 0x12c   : > { %1478 = vmatmul.mubr.msk.f32.gmra.mrb[4].mxu1 %vm799_vm3, %v796_v46 }
 0x12d   : > { %982 = vmatprep.mubr.f32.mxu1 %v1927_v14 }
 0x1f3   : > { %v535_v0 = vpop.f32.mrb[0].mxu0  ;;  %v609_v1 = vpop.f32.mrb[0].mxu1 }
 0x1f4   : > { %v659_v2 = vmul.f32 %v642_v60, %v535_v0  ;;  %v660_v3 = vmul.f32 %v646_v61, %v535_v0  ;;  %v661_v4 = vmul.f32 %v650_v62, %v535_v0  ;;  %v662_v5 = vmul.f32 %v654_v63, %v535_v0  ;;  %v1520_v7 = vpop.f32.mrb[1].mxu0  ;;  %v1531_v8 = vpop.f32.mrb[1].mxu1 }
 0x1f5   : > { %v663_v9 = vmul.f32 %v642_v60, %v609_v1  ;;  %v664_v10 = vmul.f32 %v646_v61, %v609_v1  ;;  %v665_v12 = vmul.f32 %v650_v62, %v609_v1  ;;  %v666_v13 = vmul.f32 %v654_v63, %v609_v1 }
 0x1f6   : > { %753 = vst.msk [vmem:[#allocation2] sm:$0xff] %vm455_vm0, %v659_v2  ;;  %754 = vst.msk [vmem:[#allocation2 + $0x8] sm:$0xff] %vm455_vm0, %v660_v3 }
 0x1f7   : > { %755 = vst.msk [vmem:[#allocation2 + $0x10] sm:$0xff] %vm455_vm0, %v661_v4  ;;  %756 = vst.msk [vmem:[#allocation2 + $0x18] sm:$0xff] %vm455_vm0, %v662_v5  ;;  %v1556_v11 = vpack.c.bf16 %v664_v10, %v663_v9  ;;  %v1560_v15 = vpack.c.bf16 %v666_v13, %v665_v12 }
 0x1f9   : > { %1558 = vmatpush3.bf16.xpose.msk.msra.mxu0 %vm1557_vm4, %v1556_v11 }
 0x1fa   : > { %1559 = vmatprep.subr.bf16.mxu0 %v1925_v6  ;;  %v793_v6 = vld [vmem:[%s2415_s4] sm:$0xff] }
 0x1fb   : > { %v894_v18 = vpop.f32.mrb[2].mxu1 }
 0x1fc   : > { %v896_v19 = vpop.f32.mrb[3].mxu1 }
 0x1fd   : > { %v759_v35 = vld [vmem:[#allocation2] sm:$0xff]  ;;  %v760_v36 = vld [vmem:[#allocation2 + $0x8] sm:$0xff] }
 0x1fe   : > { %v761_v37 = vld [vmem:[#allocation2 + $0x10] sm:$0xff]  ;;  %v762_v38 = vld [vmem:[#allocation2 + $0x18] sm:$0xff] }
 0x1ff   : > { %v900_v20 = vpop.f32.mrb[4].mxu1 }
 0x200   : > { %v1569_v21 = vpack.c.bf16 %v900_v20, %v894_v18  ;;  %v902_v22 = vpop.f32.mrb[5].mxu1 }
 0x201   : > { %1562 = vmatpush3.bf16.xpose.msk.msra.mxu0 %vm1557_vm4, %v1560_v15  ;;  %v1567_v23 = vpack.c.bf16 %v902_v22, %v896_v19 }
 0x202   : > { %1473 = vmatprep.subr.msk.mxu0 %vm769_vm2, %v798_v44 }
 0x208   : > { %1541 = vmatmul.mubr.msk.f32.vlgmr.msra.gmra.mrb[2].mxu0 %vm455_vm0, %v667_v16 }
 0x209   : > { %1474 = vmatpush1.msk.msra.mxu0 %vm769_vm2, %v792_v43  ;;  %880 = vmatprep.mubr.f32.mxu0 %v1927_v14 }
 0x20c   : > { %1475 = vmatmul.mubr.msk.f32.vlgmr.msra.gmra.mrb[4].mxu0 %vm799_vm3, %v793_v6 }
 0x20d   : > { %886 = vmatprep.mubr.f32.mxu0 %v1927_v14 }
 0x210   : > { %1476 = vmatmul.mubr.msk.f32.gmra.mrb[6].mxu0 %vm799_vm3, %v794_v17 }
 0x211   : > { %1233 = vmatprep.mubr.f32.mxu0 %v1927_v14 }
 0x2db   : > { %v749_v27 = vpop.f32.mrb[2].mxu0 }
 0x2dc   : > { %758 = vst.msk [vmem:[#allocation3] sm:$0xf] %vm757_vm6, %v749_v27  ;;  %v1542_v28 = vpop.f32.mrb[3].mxu0 }
 0x2df   : > { %v882_v29 = vpop.f32.mrb[4].mxu0 }
 0x2e0   : > { %v884_v30 = vpop.f32.mrb[5].mxu0 }
 0x2e3   : > { %v888_v31 = vpop.f32.mrb[6].mxu0 }
 0x2e4   : > { %v1565_v32 = vpack.c.bf16 %v888_v31, %v882_v29  ;;  %v890_v33 = vpop.f32.mrb[7].mxu0 }
 0x2e5   : > { %v1563_v34 = vpack.c.bf16 %v890_v33, %v884_v30 }
 0x2e7   : > { %1564 = vmatprep.subr.bf16.mxu1 %v1563_v34 }
 0x2e8   : > { %1566 = vmatpush1.bf16.msra.mxu1 %v1565_v32 }
 0x2e9   : > { %1568 = vmatprep.subr.bf16.mxu1 %v1567_v23 }
 0x2ec   : > { %1570 = vmatpush1.bf16.msra.mxu1 %v1569_v21 }
 0x2ef   : > { %1479 = vmatmul.mubr.msk.f32.vlgmr.msra.gmra.mrb[6].mxu1 %vm455_vm0, %v759_v35 }
 0x2f0   : > { %988 = vmatprep.mubr.f32.mxu1 %v1927_v14 }
 0x2f3   : > { %1480 = vmatmul.mubr.msk.f32.gmra.mrb[8].mxu1 %vm455_vm0, %v760_v36 }
 0x2f4   : > { %994 = vmatprep.mubr.f32.mxu1 %v1927_v14 }
 0x2f7   : > { %1481 = vmatmul.mubr.msk.f32.gmra.mrb[10].mxu1 %vm455_vm0, %v761_v37 }
 0x2f8   : > { %1000 = vmatprep.mubr.f32.mxu1 %v1927_v14 }
 0x2fb   : > { %1482 = vmatmul.mubr.msk.f32.gmra.mrb[12].mxu1 %vm455_vm0, %v762_v38 }
 0x3c2   : > { %v984_v40 = vpop.f32.mrb[6].mxu1 }
 0x3c3   : > { %v1014_v41 = vsel %vm1013_vm7, %v984_v40, -3.4028235e+38  ;;  %v986_v42 = vpop.f32.mrb[7].mxu1 }
 0x3c4   : > { %v1022_v43 = vrot.slane %v1014_v41, 4  ;;  %v1015_v44 = vsel %vm1013_vm7, %v986_v42, -3.4028235e+38 }
 0x3c5   : > { %v1028_v45 = vrot.slane %v1015_v44, 4 }
 0x3c6   : > { %v1023_v46 = vmax.f32 %v1014_v41, %v1022_v43  ;;  %v990_v47 = vpop.f32.mrb[8].mxu1 }
 0x3c7   : > { %v1029_v48 = vmax.f32 %v1015_v44, %v1028_v45  ;;  %v1016_v49 = vsel %vm1013_vm7, %v990_v47, -3.4028235e+38  ;;  %v992_v50 = vpop.f32.mrb[9].mxu1 }
 0x3c8   : > { %v1024_v14 = vrot.slane %v1023_v46, 2  ;;  %v1034_v51 = vrot.slane %v1016_v49, 4  ;;  %v1017_v52 = vsel %vm1013_vm7, %v992_v50, -3.4028235e+38 }
 0x3c9   : > { %v1030_v53 = vrot.slane %v1029_v48, 2  ;;  %v1040_v54 = vrot.slane %v1017_v52, 4 }
 0x3ca   : > { %v1025_v55 = vmax.f32 %v1023_v46, %v1024_v14  ;;  %v1035_v56 = vmax.f32 %v1016_v49, %v1034_v51  ;;  %v996_v57 = vpop.f32.mrb[10].mxu1 }
 0x3cb   : > { %v1031_v58 = vmax.f32 %v1029_v48, %v1030_v53  ;;  %v1041_v59 = vmax.f32 %v1017_v52, %v1040_v54  ;;  %v1018_v60 = vsel %vm1013_vm7, %v996_v57, -3.4028235e+38  ;;  %v998_v61 = vpop.f32.mrb[11].mxu1 }
 0x3cc   : > { %v1026_v62 = vrot.slane %v1025_v55, 1  ;;  %v1036_v63 = vrot.slane %v1035_v56, 2  ;;  %v1046_v0 = vrot.slane %v1018_v60, 4  ;;  %v1019_v1 = vsel %vm1013_vm7, %v998_v61, -3.4028235e+38 }
 0x3cd   : > { %v1032_v2 = vrot.slane %v1031_v58, 1  ;;  %v1042_v3 = vrot.slane %v1041_v59, 2  ;;  %v1052_v4 = vrot.slane %v1019_v1, 4 }
 0x3ce   : > { %v1027_v5 = vmax.f32 %v1025_v55, %v1026_v62  ;;  %v1037_v7 = vmax.f32 %v1035_v56, %v1036_v63  ;;  %v1047_v8 = vmax.f32 %v1018_v60, %v1046_v0  ;;  %v1002_v9 = vpop.f32.mrb[12].mxu1 }
 0x3cf   : > { %v1033_v10 = vmax.f32 %v1031_v58, %v1032_v2  ;;  %v1043_v11 = vmax.f32 %v1041_v59, %v1042_v3  ;;  %v1053_v12 = vmax.f32 %v1019_v1, %v1052_v4  ;;  %v1020_v13 = vsel %vm1013_vm7, %v1002_v9, -3.4028235e+38  ;;  %v1004_v15 = vpop.f32.mrb[13].mxu1 }
 0x3d0   : > { %v1070_v16 = vsub.f32 %v1014_v41, %v1027_v5  ;;  %v1038_v6 = vrot.slane %v1037_v7, 1  ;;  %v1048_v17 = vrot.slane %v1047_v8, 2  ;;  %v1058_v18 = vrot.slane %v1020_v13, 4 }
 0x3d1   : > { %v1071_v19 = vsub.f32 %v1015_v44, %v1033_v10  ;;  %v1044_v20 = vrot.slane %v1043_v11, 1  ;;  %v1054_v21 = vrot.slane %v1053_v12, 2  ;;  %v1021_v22 = vsel %vm1013_vm7, %v1004_v15, -3.4028235e+38 }
 0x3d2   : > { %v1078_v23 = vmul.f32 1.442695, %v1070_v16  ;;  %v1039_v24 = vmax.f32 %v1037_v7, %v1038_v6  ;;  %v1049_v25 = vmax.f32 %v1047_v8, %v1048_v17  ;;  %v1059_v26 = vmax.f32 %v1020_v13, %v1058_v18 }
 0x3d3   : > { %v1080_v27 = vmul.f32 1.442695, %v1071_v19  ;;  %v1045_v28 = vmax.f32 %v1043_v11, %v1044_v20  ;;  %v1055_v29 = vmax.f32 %v1053_v12, %v1054_v21  ;;  %v1064_v30 = vrot.slane %v1021_v22, 4 }
 0x3d4   : > { %1678 = vpow2.f32 %v1078_v23  ;;  %v1072_v31 = vsub.f32 %v1016_v49, %v1039_v24  ;;  %v1050_v32 = vrot.slane %v1049_v25, 1  ;;  %v1060_v33 = vrot.slane %v1059_v26, 2 }
 0x3d5   : > { %1680 = vpow2.f32 %v1080_v27  ;;  %v1073_v34 = vsub.f32 %v1017_v52, %v1045_v28  ;;  %v1056_v35 = vrot.slane %v1055_v29, 1  ;;  %v1065_v36 = vmax.f32 %v1021_v22, %v1064_v30 }
 0x3d6   : > { %v1082_v37 = vmul.f32 1.442695, %v1072_v31  ;;  %v1051_v38 = vmax.f32 %v1049_v25, %v1050_v32  ;;  %v1061_v39 = vmax.f32 %v1059_v26, %v1060_v33 }
 0x3d7   : > { %v1084_v40 = vmul.f32 1.442695, %v1073_v34  ;;  %v1057_v41 = vmax.f32 %v1055_v29, %v1056_v35  ;;  %v1066_v42 = vrot.slane %v1065_v36, 2 }
 0x3d8   : > { %1682 = vpow2.f32 %v1082_v37  ;;  %v1074_v43 = vsub.f32 %v1018_v60, %v1051_v38  ;;  %v1062_v44 = vrot.slane %v1061_v39, 1 }
 0x3d9   : > { %1684 = vpow2.f32 %v1084_v40  ;;  %v1075_v45 = vsub.f32 %v1019_v1, %v1057_v41  ;;  %v1067_v46 = vmax.f32 %v1065_v36, %v1066_v42 }
 0x3da   : > { %v1086_v47 = vmul.f32 1.442695, %v1074_v43  ;;  %v1063_v48 = vmax.f32 %v1061_v39, %v1062_v44 }
 0x3db   : > { %v1088_v49 = vmul.f32 1.442695, %v1075_v45  ;;  %v1068_v50 = vrot.slane %v1067_v46, 1 }
 0x3dc   : > { %1686 = vpow2.f32 %v1086_v47  ;;  %v1076_v14 = vsub.f32 %v1020_v13, %v1063_v48 }
 0x3dd   : > { %1688 = vpow2.f32 %v1088_v49  ;;  %v1069_v51 = vmax.f32 %v1067_v46, %v1068_v50 }
 0x3de   : > { %v2282_v52 = vpop.eup %1678  ;;  %v1090_v53 = vmul.f32 1.442695, %v1076_v14 }
 0x3df   : > { %v2284_v54 = vpop.eup %1680  ;;  %v1077_v55 = vsub.f32 %v1021_v22, %v1069_v51  ;;  %v1094_v56 = vrot.slane %v2282_v52, 4 }
 0x3e0   : > { %1690 = vpow2.f32 %v1090_v53  ;;  %v1100_v57 = vrot.slane %v2284_v54, 4 }
 0x3e1   : > { %v1092_v58 = vmul.f32 1.442695, %v1077_v55  ;;  %v1095_v59 = vadd.f32 %v2282_v52, %v1094_v56 }
 0x3e2   : > { %v2289_v60 = vpop.eup %1682  ;;  %v1101_v61 = vadd.f32 %v2284_v54, %v1100_v57 }
 0x3e3   : > { %v2292_v62 = vpop.eup %1684  ;;  %1692 = vpow2.f32 %v1092_v58  ;;  %v1096_v63 = vrot.slane %v1095_v59, 2  ;;  %v1106_v0 = vrot.slane %v2289_v60, 4 }
 0x3e4   : > { %v1102_v1 = vrot.slane %v1101_v61, 2  ;;  %v1112_v2 = vrot.slane %v2292_v62, 4 }
 0x3e5   : > { %v1097_v3 = vadd.f32 %v1096_v63, %v1095_v59  ;;  %v1107_v4 = vadd.f32 %v2289_v60, %v1106_v0 }
 0x3e6   : > { %v2297_v5 = vpop.eup %1686  ;;  %v1103_v7 = vadd.f32 %v1102_v1, %v1101_v61  ;;  %v1113_v8 = vadd.f32 %v2292_v62, %v1112_v2 }
 0x3e7   : > { %v2300_v9 = vpop.eup %1688  ;;  %v1098_v10 = vrot.slane %v1097_v3, 1  ;;  %v1108_v11 = vrot.slane %v1107_v4, 2  ;;  %v1118_v12 = vrot.slane %v2297_v5, 4 }
 0x3e8   : > { %v1104_v13 = vrot.slane %v1103_v7, 1  ;;  %v1114_v15 = vrot.slane %v1113_v8, 2  ;;  %v1124_v16 = vrot.slane %v2300_v9, 4 }
 0x3e9   : > { %v1099_v6 = vadd.f32 %v1098_v10, %v1097_v3  ;;  %v1109_v17 = vadd.f32 %v1108_v11, %v1107_v4  ;;  %v1119_v18 = vadd.f32 %v2297_v5, %v1118_v12  ;;  %v763_v3 = vld [vmem:[#allocation3] sm:$0xf] }
 0x3ea   : > { %v1691_v19 = vpop.eup %1690  ;;  %v1105_v20 = vadd.f32 %v1104_v13, %v1103_v7  ;;  %v1115_v21 = vadd.f32 %v1114_v15, %v1113_v8  ;;  %v1125_v22 = vadd.f32 %v2300_v9, %v1124_v16 }
 0x3eb   : > { %v1110_v23 = vrot.slane %v1109_v17, 1  ;;  %1694 = vrcp.f32 %v1099_v6  ;;  %v1120_v24 = vrot.slane %v1119_v18, 2  ;;  %v1130_v25 = vrot.slane %v1691_v19, 4 }
 0x3ec   : > { %v1116_v26 = vrot.slane %v1115_v21, 1  ;;  %1696 = vrcp.f32 %v1105_v20  ;;  %v1126_v27 = vrot.slane %v1125_v22, 2 }
 0x3ed   : > { %v1693_v28 = vpop.eup %1692  ;;  %v1111_v29 = vadd.f32 %v1110_v23, %v1109_v17  ;;  %v1121_v30 = vadd.f32 %v1120_v24, %v1119_v18  ;;  %v1131_v31 = vadd.f32 %v1691_v19, %v1130_v25 }
 0x3ee   : > { %v1117_v32 = vadd.f32 %v1116_v26, %v1115_v21  ;;  %v1127_v33 = vadd.f32 %v1126_v27, %v1125_v22  ;;  %v1136_v34 = vrot.slane %v1693_v28, 4 }
 0x3ef   : > { %1698 = vrcp.f32 %v1111_v29  ;;  %v1122_v35 = vrot.slane %v1121_v30, 1  ;;  %v1132_v36 = vrot.slane %v1131_v31, 2 }
 0x3f0   : > { %1700 = vrcp.f32 %v1117_v32  ;;  %v1128_v37 = vrot.slane %v1127_v33, 1  ;;  %v1137_v38 = vadd.f32 %v1693_v28, %v1136_v34 }
 0x3f1   : > { %v1123_v39 = vadd.f32 %v1122_v35, %v1121_v30  ;;  %v1133_v40 = vadd.f32 %v1132_v36, %v1131_v31 }
 0x3f2   : > { %v1129_v41 = vadd.f32 %v1128_v37, %v1127_v33  ;;  %v1138_v42 = vrot.slane %v1137_v38, 2 }
 0x3f3   : > { %v1134_v43 = vrot.slane %v1133_v40, 1  ;;  %1702 = vrcp.f32 %v1123_v39 }
 0x3f4   : > { %v1139_v44 = vadd.f32 %v1138_v42, %v1137_v38  ;;  %1704 = vrcp.f32 %v1129_v41 }
 0x3f5   : > { %v1695_v45 = vpop.eup %1694  ;;  %v1135_v46 = vadd.f32 %v1134_v43, %v1133_v40 }
 0x3f6   : > { %v1697_v47 = vpop.eup %1696  ;;  %v1143_v48 = vmul.f32 %v1695_v45, %v2282_v52  ;;  %v1140_v49 = vrot.slane %v1139_v44, 1 }
 0x3f7   : > { %v1145_v50 = vmul.f32 %v1697_v47, %v2284_v54  ;;  %1706 = vrcp.f32 %v1135_v46 }
 0x3f8   : > { %1158 = vst [vmem:[%s2309_s16] sm:$0xff] %v1143_v48  ;;  %v1141_v14 = vadd.f32 %v1140_v49, %v1139_v44 }
 0x3f9   : > { %v1699_v51 = vpop.eup %1698  ;;  %1159 = vst [vmem:[%s2309_s16 + $0x8] sm:$0xff] %v1145_v50 }
 0x3fa   : > { %v1701_v53 = vpop.eup %1700  ;;  %v1147_v55 = vmul.f32 %v1699_v51, %v2289_v60  ;;  %1708 = vrcp.f32 %v1141_v14 }
 0x3fb   : > { %v1149_v52 = vmul.f32 %v1701_v53, %v2292_v62 }
 0x3fc   : > { %1160 = vst [vmem:[%s2309_s16 + $0x10] sm:$0xff] %v1147_v55  ;;  %v1573_v54 = vpack.c.bf16 %v1147_v55, %v1143_v48 }
 0x3fd   : > { %v1703_v56 = vpop.eup %1702  ;;  %1161 = vst [vmem:[%s2309_s16 + $0x18] sm:$0xff] %v1149_v52  ;;  %v1571_v57 = vpack.c.bf16 %v1149_v52, %v1145_v50 }
 0x3fe   : > { %v1705_v58 = vpop.eup %1704  ;;  %v1151_v59 = vmul.f32 %v1703_v56, %v2297_v5 }
 0x3ff   : > { %1572 = vmatprep.subr.bf16.mxu0 %v1571_v57  ;;  %v1153_v61 = vmul.f32 %v1705_v58, %v2300_v9 }
 0x400   : > { %1574 = vmatpush1.bf16.msra.mxu0 %v1573_v54  ;;  %1162 = vst [vmem:[%s2309_s16 + $0x20] sm:$0xff] %v1151_v59 }
 0x401   : > { %v1707_v60 = vpop.eup %1706  ;;  %1163 = vst [vmem:[%s2309_s16 + $0x28] sm:$0xff] %v1153_v61 }
 0x402   : > { %v1155_v62 = vmul.f32 %v1707_v60, %v1691_v19 }
 0x404   : > { %v1709_v63 = vpop.eup %1708  ;;  %1164 = vst [vmem:[%s2309_s16 + $0x30] sm:$0xff] %v1155_v62  ;;  %v1577_v0 = vpack.c.bf16 %v1155_v62, %v1151_v59 }
 0x405   : > { %v1157_v1 = vmul.f32 %v1709_v63, %v1693_v28 }
 0x407   : > { %1165 = vst [vmem:[%s2309_s16 + $0x38] sm:$0xff] %v1157_v1  ;;  %v1575_v2 = vpack.c.bf16 %v1157_v1, %v1153_v61 }
 0x409   : > { %1576 = vmatprep.subr.bf16.mxu0 %v1575_v2 }
 0x40a   : > { %1578 = vmatpush1.bf16.msra.mxu0 %v1577_v0 }
 0x40d   : > { %1483 = vmatmul.mubr.msk.f32.vlgmr.msra.gmra.mrb[8].mxu0 %vm455_vm0, %v763_v3 }
 0x40e   : > { %1811 = shalt.err (!%p1808_p8)
}
 0x40f   : > { %s1812_s21 = scalar_lea.hbm %s2329_s11, 1024  ;;  %s1816_s27 = scalar_lea.hbm %s2420_s9, 2048 }
 0x410   : > { %p1813_p9 = scmp.ne.s32.totalorder %s2329_s11, %s1812_s21  ;;  %p1817_p11 = scmp.lt.u32.totalorder %s2329_s11, %s2420_s9 }
 0x411   : > { %p1818_p3 = scmp.lt.u32.totalorder %s1816_s27, %s1812_s21  ;;  %p1820_p0 = scmp.lt.u32.totalorder %s1812_s21, %s2329_s11 }
 0x412   : > { %p1814_p6 = pnand %p1813_p9, %p2454_p5 }
 0x413   : > { %p1819_p12 = por %p1818_p3, %p1817_p11 }
 0x414   : > { %p1815_p13 = pneg %p1814_p6 }
 0x415   : > { %p1821_p10 = por %p1820_p0, %p1819_p12 }
 0x417   : > { %p1822_p1 = pnand %p1821_p10, %p1815_p13 }
 0x419   : > { %1825 = shalt.err (!%p1822_p1)
}
 0x41a   : > { %s1931_s16 = smov 256   ;;  %s1932_s3 = smov 16  }
 0x41b   : > { %1590 = dma.vmem_to_hbm [thread:$0]  (%p2454_p5), %s2331_s29, 1024, %s2329_s11, %s1251_s17, %s1931_s16, %s1931_s16, %s1932_s3  }
 0x41c   : > { %s1493_s25 = sshll.u32 %s1912_s12, 7  ;;  %s434_s23 = scalar_lea.vmem [#allocation10], %s2165_s30 }
 0x41d   : > { %s1267_s24 = sshll.u32 %s434_s23, 4  ;;  %s2455_s13 = sld [smem:[#allocation25_spill]]  ;;  %s2364_s24 = int_to_ptr.vmem [resolvable:$true] %s1267_s24 }
 0x41e   : > { %s1246_s18 = scalar_lea.sflag [#allocation6], %s2162_s20  ;;  %s1826_s27 = scalar_lea.vmem %s2364_s24, 128 }
 0x41f   : > { %p1827_p2 = scmp.ne.s32.totalorder %s2364_s24, %s1826_s27  ;;  %s1933_s12 = smov [#allocation10]  }
 0x420   : > { %s1830_s30 = sshll.u32 %s1933_s12, 4  ;;  %s1831_s30 = int_to_ptr.vmem [resolvable:$false] %s1830_s30 }
 0x421   : > { %p1828_p7 = pnand %p1827_p2, %p2454_p5  ;;  %s1832_s29 = scalar_lea.vmem %s1831_s30, 256 }
 0x422   : > { %p1833_p8 = scmp.lt.s32.totalorder %s2364_s24, %s1831_s30  ;;  %p1834_p9 = scmp.lt.s32.totalorder %s1832_s29, %s1826_s27 }
 0x423   : > { %s2456_s21 = smov %s2455_s13  ;;  %s2362_s26 = scalar_lea.hbm %s2455_s13, %s1493_s25 }
 0x424   : > { %p1829_p4 = pneg %p1828_p7  ;;  %p1835_p6 = por %p1834_p9, %p1833_p8 }
 0x426   : > { %p1836_p13 = pnand %p1835_p6, %p1829_p4 }
 0x4e0   : > { %v1235_v4 = vpop.f32.mrb[8].mxu0 }
 0x4e1   : > { %v1237_v5 = vpop.f32.mrb[9].mxu0 }
 0x4e2   : > { %v1242_v7 = vcombine.low %v1235_v4, %v1237_v5 }
 0x4e4   : > { %1244 = vst [vmem:[%s434_s23] sm:$0xff] %v1242_v7 }
 0x4e5   : > { %1839 = shalt.err (!%p1836_p13)
}
 0x4e6   : > { %s1840_s20 = scalar_lea.hbm %s2362_s26, 128  ;;  %s1844_s19 = scalar_lea.hbm %s2456_s21, 256 }
 0x4e7   : > { %p1841_p11 = scmp.ne.s32.totalorder %s2362_s26, %s1840_s20  ;;  %p1845_p0 = scmp.lt.u32.totalorder %s2362_s26, %s2456_s21 }
 0x4e8   : > { %p1846_p10 = scmp.lt.u32.totalorder %s1844_s19, %s1840_s20  ;;  %p1848_p2 = scmp.lt.u32.totalorder %s1840_s20, %s2362_s26 }
 0x4e9   : > { %p1842_p3 = pnand %p1841_p11, %p2454_p5 }
 0x4ea   : > { %p1847_p1 = por %p1846_p10, %p1845_p0 }
 0x4eb   : > { %p1843_p12 = pneg %p1842_p3 }
 0x4ec   : > { %p1849_p7 = por %p1848_p2, %p1847_p1 }
 0x4ee   : > { %p1850_p4 = pnand %p1849_p7, %p1843_p12 }
 0x4f0   : > { %1853 = shalt.err (!%p1850_p4)
}
 0x4f1   : > { %1589 = dma.vmem_to_hbm [thread:$0]  (%p2454_p5), %s2364_s24, 128, %s2362_s26, %s1246_s18  }
 0x4f2 PF: > { %s2457_s3 = sld [smem:[#allocation18_spill]]  ;;  %s2458_s25 = sld [smem:[#allocation21_spill]] }
 0x4f3   : > { %p2460_p9 = scmp.ge.s32.totalorder %s1920_s14, 2 }
 0x4f8   : > { %s1297_s23 = sand.u32 1, %s2457_s3   ;;  %p2459_p8 = scmp.ne.s32.totalorder %s2458_s25, 0 }
 0x4f9   : > { %s1298_s15 = scalar_lea.sflag [#allocation6], %s1297_s23 }
 0x4fa   : > { %p1605_p6 = pnand %p2460_p9, %p2459_p8 }
 0x4fc   : > { %1891 = dma.done.wait (!%p1605_p6), %s1298_s15, 128  }
 0x4fd   : > { %1893 = vsyncadd (!%p1605_p6), %s1298_s15, 4294967168  ;;  %s1307_s8 = scalar_lea.sflag [#allocation12], %s1297_s23 }
 0x4fe   : > { %1895 = dma.done.wait (!%p1605_p6), %s1307_s8, 1024  }
 0x4ff   : > { %1897 = vsyncadd (!%p1605_p6), %s1307_s8, 4294966272  ;;  %s32_s14 = sadd.s32 1, %s1920_s14   ;;  %s2461_s22 = sld [smem:[#allocation19_spill]] }
 0x500   : > { %p29_p13 = scmp.ge.s32.totalorder %s32_s14, 4   ;;  %s2462_s11 = sld [smem:[#allocation23_spill]] }
 0x501   : > { %s2463_s12 = sld [smem:[#allocation20_spill]]  ;;  %s2464_s13 = sld [smem:[#allocation22_spill]] }
 0x502   : > { %s2465_s30 = smov %s1904_s10  ;;  %31 = sbr.rel (!%p29_p13) target bundleno = 13 (0xd), region = 138 }
 0x505   : > { %s2466_s10 = smov %s2461_s22 }
 0x509   :  { %1312 = vsyncpa [#allocation5], 1 }
 0x50a   :  { %1314 = vsyncpa [#allocation5 + $0x1], 1 }
 0x50b   :  { %1315 = vsyncpa [#allocation8], 1 }
 0x50c   :  { %1317 = vsyncpa [#allocation8 + $0x1], 1 }
 0x50d   :  { %1318 = vsyncpa [#allocation6], 1 }
 0x50e   :  { %1320 = vsyncpa [#allocation6 + $0x1], 1 }
 0x50f   :  { %1321 = vsyncpa [#allocation12], 1 }
 0x510   :  { %1323 = vsyncpa [#allocation12 + $0x1], 1 }

</bundles_post_ra>
